<compile_context>
chip_gen: v6e
topology: v6e:2x2x1
jax: 0.10.0
libtpu: 0.0.40
codegen_flags: <defaults>
</compile_context>

<pallas_src>
import math

import jax
import jax.numpy as jnp
from jax.experimental import pallas as pl

_BN_EPS = 1e-5


def _gcn_body_kernel(x_ref, w1_ref, w2_ref, adj_ref, st_ref, o_ref):
    """Fused gcin -> BN -> ReLU -> gcout -> BN -> ReLU over the whole batch.

    x_ref   : (B*N, Fin)      f32
    w1_ref  : (Fin, H)        bf16
    w2_ref  : (H, Fin)        bf16
    adj_ref : (2, B*N, B*N)   bf16   (block-diag adj1 / adj2)
    st_ref  : (4, B*N, P)     f32    P = max(H, Fin); slabs are
                                     [s1, t1(+b1*s1), s2, t2(+b2*s2)]
    o_ref   : (B*N, Fin)      f32
    """
    H = w1_ref.shape[1]
    Fin = o_ref.shape[1]

    # --- layer 1: y1 = relu( ((adj1 @ x) @ W1) * s1 + t1' )  (bias folded in t1')
    x_bf = x_ref[...].astype(jnp.bfloat16)
    ax = jnp.dot(adj_ref[0], x_bf, preferred_element_type=jnp.float32)
    y1 = jnp.dot(ax.astype(jnp.bfloat16), w1_ref[...],
                 preferred_element_type=jnp.float32)
    y1 = jnp.maximum(y1 * st_ref[0][:, :H] + st_ref[1][:, :H], 0.0)

    # --- layer 2: y2 = relu( (adj2 @ (y1 @ W2)) * s2 + t2' )
    sup2 = jnp.dot(y1.astype(jnp.bfloat16), w2_ref[...],
                   preferred_element_type=jnp.float32)
    y2 = jnp.dot(adj_ref[1], sup2.astype(jnp.bfloat16),
                 preferred_element_type=jnp.float32)
    y2 = jnp.maximum(y2 * st_ref[2][:, :Fin] + st_ref[3][:, :Fin], 0.0)

    o_ref[...] = y2.astype(o_ref.dtype)


def prepare_params(params, batch_size):
    """One-time (out of the hot path) parameter preprocessing.

    Builds the block-diagonal adjacencies, folds eval-mode BatchNorm and the
    GraphConvolution biases into per-position scale/shift, casts MXU operands
    to bf16 and packs everything into 5 kernel operands.
    """
    B = batch_size
    N = params["adj1"].shape[0]
    Fin, H = params["w1"].shape
    P = max(H, Fin)

    eye = jnp.eye(B, dtype=jnp.float32)
    adj_bd = jnp.stack([jnp.kron(eye, params["adj1"]),
                        jnp.kron(eye, params["adj2"])]).astype(jnp.bfloat16)

    def fold(gamma, beta, mean, var, feat, bias):
        if B > 1:
            scale = gamma / jnp.sqrt(var + _BN_EPS)
            shift = beta - mean * scale
        else:  # PyTorch module skips BN entirely when b == 1
            scale = jnp.ones_like(gamma)
            shift = jnp.zeros_like(beta)
        scale = scale.reshape(N, feat)
        # fold the GraphConvolution bias:  (y + b)*s + t == y*s + (t + b*s)
        shift = shift.reshape(N, feat) + scale * bias.reshape(1, feat)
        scale = jnp.tile(scale, (B, 1))
        shift = jnp.tile(shift, (B, 1))
        if P - feat:
            scale = jnp.pad(scale, ((0, 0), (0, P - feat)))
            shift = jnp.pad(shift, ((0, 0), (0, P - feat)))
        return scale, shift

    s1, t1 = fold(params["bn1_gamma"], params["bn1_beta"],
                  params["bn1_mean"], params["bn1_var"], H, params["b1"])
    s2, t2 = fold(params["bn2_gamma"], params["bn2_beta"],
                  params["bn2_mean"], params["bn2_var"], Fin, params["b2"])
    st = jnp.stack([s1, t1, s2, t2])                       # (4, B*N, P) f32

    return dict(
        w1=params["w1"].astype(jnp.bfloat16),
        w2=params["w2"].astype(jnp.bfloat16),
        adj_bd=adj_bd,
        st=st,
        wl=params["wl"],                                   # head stays f32/XLA
        bl=params["bl"],
    )


def gcn_class_forward(x, prep):
    """x: (B, N, Fin) f32, prep: prepare_params(...) -> log-probs (B, C) f32."""
    B, N, Fin = x.shape
    H = prep["w1"].shape[1]
    BN = B * N

    x2 = x.reshape(BN, Fin)                                # free relayout in XLA

    flops = (2 * BN * BN * Fin + 2 * BN * Fin * H          # layer 1
             + 2 * BN * H * Fin + 2 * BN * BN * Fin        # layer 2
             + 4 * BN * (H + Fin))                         # FMA + ReLU epilogue
    bytes_accessed = (
        (x2.size + prep["st"].size + BN * Fin) * 4
        + (prep["w1"].size + prep["w2"].size + prep["adj_bd"].size) * 2)

    y = pl.pallas_call(
        _gcn_body_kernel,
        out_shape=jax.ShapeDtypeStruct((BN, Fin), jnp.float32),
        cost_estimate=pl.CostEstimate(flops=int(flops), transcendentals=0,
                                      bytes_accessed=int(bytes_accessed)),
    )(x2, prep["w1"], prep["w2"], prep["adj_bd"], prep["st"])

    # classifier head (~70 KFLOP): plain XLA, fused by the surrounding jit.
    logits = y.reshape(B, N * Fin) @ prep["wl"] + prep["bl"]
    return jax.nn.log_softmax(logits, axis=1)


def reference(x, params):
    """Pure-JAX f32 reference with the same (eval-mode) semantics."""
    B, N, Fin = x.shape
    H = params["w1"].shape[1]

    y = jnp.matmul(x, params["w1"])
    y = jnp.matmul(params["adj1"], y) + params["b1"]
    if B > 1:
        yf = y.reshape(B, -1)
        yf = ((yf - params["bn1_mean"]) / jnp.sqrt(params["bn1_var"] + _BN_EPS)
              * params["bn1_gamma"] + params["bn1_beta"])
        y = yf.reshape(B, N, H)
    y = jnp.maximum(y, 0.0)
    y = jnp.matmul(y, params["w2"])
    y = jnp.matmul(params["adj2"], y) + params["b2"]
    if B > 1:
        yf = y.reshape(B, -1)
        yf = ((yf - params["bn2_mean"]) / jnp.sqrt(params["bn2_var"] + _BN_EPS)
              * params["bn2_gamma"] + params["bn2_beta"])
        y = yf.reshape(B, N, Fin)
    y = jnp.maximum(y, 0.0)
    logits = y.reshape(B, N * Fin) @ params["wl"] + params["bl"]
    return jax.nn.log_softmax(logits, axis=1)


if __name__ == "__main__":
    # GCN_class defaults: input_feature=25, hidden_feature=32, node_n=57, classes=12.
    B, N, Fin, H, C = 2, 57, 25, 32, 12

    key = jax.random.PRNGKey(0)
    ks = jax.random.split(key, 17)

    def u(k, shape, lo, hi):
        return jax.random.uniform(k, shape, minval=lo, maxval=hi, dtype=jnp.float32)

    sd1 = 1.0 / math.sqrt(H)         # gcin reset_parameters: 1/sqrt(out_features)
    sd2 = 1.0 / math.sqrt(Fin)       # gcout
    sdl = 1.0 / math.sqrt(N * Fin)   # nn.Linear default

    params = dict(
        w1=u(ks[0], (Fin, H), -sd1, sd1),
        adj1=u(ks[1], (N, N), -sd1, sd1),
        b1=u(ks[2], (H,), -sd1, sd1),
        w2=u(ks[3], (H, Fin), -sd2, sd2),
        adj2=u(ks[4], (N, N), -sd2, sd2),
        b2=u(ks[5], (Fin,), -sd2, sd2),
        bn1_gamma=u(ks[6], (N * H,), 0.5, 1.5),
        bn1_beta=u(ks[7], (N * H,), -0.2, 0.2),
        bn1_mean=u(ks[8], (N * H,), -0.1, 0.1),
        bn1_var=u(ks[9], (N * H,), 0.5, 1.5),
        bn2_gamma=u(ks[10], (N * Fin,), 0.5, 1.5),
        bn2_beta=u(ks[11], (N * Fin,), -0.2, 0.2),
        bn2_mean=u(ks[12], (N * Fin,), -0.1, 0.1),
        bn2_var=u(ks[13], (N * Fin,), 0.5, 1.5),
        wl=u(ks[14], (N * Fin, C), -sdl, sdl),
        bl=u(ks[15], (C,), -sdl, sdl),
    )
    x = jax.random.normal(ks[16], (B, N, Fin), dtype=jnp.float32)

    # One-time parameter preprocessing (NOT in the per-forward hot path).
    prep = jax.tree_util.tree_map(jax.block_until_ready, prepare_params(params, B))

    fwd = jax.jit(gcn_class_forward)
    out = jax.block_until_ready(fwd(x, prep))

    ref = reference(x, params)
    assert out.shape == (B, C), f"bad shape {out.shape}"
    # bf16 MXU operands (f32 accumulation) -> loose-but-meaningful tolerance.
    assert jnp.allclose(out, ref, atol=5e-2, rtol=5e-2), (
        f"mismatch vs reference: max abs err = {jnp.max(jnp.abs(out - ref))}")
    # log-probabilities should normalize.
    assert jnp.allclose(jnp.sum(jnp.exp(out), axis=1), 1.0, atol=1e-2)

    print("KERNEL_OK")
</pallas_src>

<mosaic_0001>
module attributes {stable_mosaic.version = 11 : i64} {
  func.func @_gcn_body_kernel(%arg0: memref<114x25xf32, #tpu.memory_space<vmem>>, %arg1: memref<25x32xbf16, #tpu.memory_space<vmem>>, %arg2: memref<32x25xbf16, #tpu.memory_space<vmem>>, %arg3: memref<2x114x114xbf16, #tpu.memory_space<vmem>>, %arg4: memref<4x114x32xf32, #tpu.memory_space<vmem>>, %arg5: memref<114x25xf32, #tpu.memory_space<vmem>>) attributes {dimension_semantics = [], scalar_prefetch = 0 : i64, scratch_operands = 0 : i64, tpu.core_type = #tpu.core_type<tc>} {
    %c0 = arith.constant 0 : index
    %c0_0 = arith.constant 0 : index
    %0 = vector.load %arg0[%c0, %c0_0] : memref<114x25xf32, #tpu.memory_space<vmem>>, vector<114x25xf32>
    %1 = arith.truncf %0 : vector<114x25xf32> to vector<114x25xbf16>
    %c0_1 = arith.constant 0 : index
    %c0_2 = arith.constant 0 : index
    %c0_3 = arith.constant 0 : index
    %2 = vector.load %arg3[%c0_1, %c0_2, %c0_3] : memref<2x114x114xbf16, #tpu.memory_space<vmem>>, vector<1x114x114xbf16>
    %3 = vector.shape_cast %2 : vector<1x114x114xbf16> to vector<114x114xbf16>
    %cst = arith.constant dense<0.000000e+00> : vector<114x25xf32>
    %4 = tpu.matmul %3, %1, %cst {dimension_numbers = #tpu.dot_dimension_numbers<[1], [0], [0], [1], [0, 0, 1, 1], [], []>} : vector<114x114xbf16>, vector<114x25xbf16>, vector<114x25xf32> -> vector<114x25xf32>
    %5 = arith.truncf %4 : vector<114x25xf32> to vector<114x25xbf16>
    %c0_4 = arith.constant 0 : index
    %c0_5 = arith.constant 0 : index
    %6 = vector.load %arg1[%c0_4, %c0_5] : memref<25x32xbf16, #tpu.memory_space<vmem>>, vector<25x32xbf16>
    %cst_6 = arith.constant dense<0.000000e+00> : vector<114x32xf32>
    %7 = tpu.matmul %5, %6, %cst_6 {dimension_numbers = #tpu.dot_dimension_numbers<[1], [0], [0], [1], [0, 0, 1, 1], [], []>} : vector<114x25xbf16>, vector<25x32xbf16>, vector<114x32xf32> -> vector<114x32xf32>
    %c0_7 = arith.constant 0 : index
    %c0_8 = arith.constant 0 : index
    %c0_9 = arith.constant 0 : index
    %8 = vector.load %arg4[%c0_7, %c0_8, %c0_9] : memref<4x114x32xf32, #tpu.memory_space<vmem>>, vector<1x114x32xf32>
    %9 = vector.shape_cast %8 : vector<1x114x32xf32> to vector<114x32xf32>
    %10 = arith.mulf %7, %9 : vector<114x32xf32>
    %c1 = arith.constant 1 : index
    %c0_10 = arith.constant 0 : index
    %c0_11 = arith.constant 0 : index
    %11 = vector.load %arg4[%c1, %c0_10, %c0_11] : memref<4x114x32xf32, #tpu.memory_space<vmem>>, vector<1x114x32xf32>
    %12 = vector.shape_cast %11 : vector<1x114x32xf32> to vector<114x32xf32>
    %13 = arith.addf %10, %12 : vector<114x32xf32>
    %cst_12 = arith.constant 0.000000e+00 : f32
    %14 = vector.broadcast %cst_12 : f32 to vector<114x32xf32>
    %15 = arith.maximumf %13, %14 : vector<114x32xf32>
    %16 = arith.truncf %15 : vector<114x32xf32> to vector<114x32xbf16>
    %c0_13 = arith.constant 0 : index
    %c0_14 = arith.constant 0 : index
    %17 = vector.load %arg2[%c0_13, %c0_14] : memref<32x25xbf16, #tpu.memory_space<vmem>>, vector<32x25xbf16>
    %cst_15 = arith.constant dense<0.000000e+00> : vector<114x25xf32>
    %18 = tpu.matmul %16, %17, %cst_15 {dimension_numbers = #tpu.dot_dimension_numbers<[1], [0], [0], [1], [0, 0, 1, 1], [], []>} : vector<114x32xbf16>, vector<32x25xbf16>, vector<114x25xf32> -> vector<114x25xf32>
    %c1_16 = arith.constant 1 : index
    %c0_17 = arith.constant 0 : index
    %c0_18 = arith.constant 0 : index
    %19 = vector.load %arg3[%c1_16, %c0_17, %c0_18] : memref<2x114x114xbf16, #tpu.memory_space<vmem>>, vector<1x114x114xbf16>
    %20 = vector.shape_cast %19 : vector<1x114x114xbf16> to vector<114x114xbf16>
    %21 = arith.truncf %18 : vector<114x25xf32> to vector<114x25xbf16>
    %cst_19 = arith.constant dense<0.000000e+00> : vector<114x25xf32>
    %22 = tpu.matmul %20, %21, %cst_19 {dimension_numbers = #tpu.dot_dimension_numbers<[1], [0], [0], [1], [0, 0, 1, 1], [], []>} : vector<114x114xbf16>, vector<114x25xbf16>, vector<114x25xf32> -> vector<114x25xf32>
    %c2 = arith.constant 2 : index
    %c0_20 = arith.constant 0 : index
    %c0_21 = arith.constant 0 : index
    %23 = vector.load %arg4[%c2, %c0_20, %c0_21] : memref<4x114x32xf32, #tpu.memory_space<vmem>>, vector<1x114x32xf32>
    %24 = vector.shape_cast %23 : vector<1x114x32xf32> to vector<114x32xf32>
    %25 = vector.extract_strided_slice %24 {offsets = [0, 0], sizes = [114, 25], strides = [1, 1]} : vector<114x32xf32> to vector<114x25xf32>
    %26 = arith.mulf %22, %25 : vector<114x25xf32>
    %c3 = arith.constant 3 : index
    %c0_22 = arith.constant 0 : index
    %c0_23 = arith.constant 0 : index
    %27 = vector.load %arg4[%c3, %c0_22, %c0_23] : memref<4x114x32xf32, #tpu.memory_space<vmem>>, vector<1x114x32xf32>
    %28 = vector.shape_cast %27 : vector<1x114x32xf32> to vector<114x32xf32>
    %29 = vector.extract_strided_slice %28 {offsets = [0, 0], sizes = [114, 25], strides = [1, 1]} : vector<114x32xf32> to vector<114x25xf32>
    %30 = arith.addf %26, %29 : vector<114x25xf32>
    %cst_24 = arith.constant 0.000000e+00 : f32
    %31 = vector.broadcast %cst_24 : f32 to vector<114x25xf32>
    %32 = arith.maximumf %30, %31 : vector<114x25xf32>
    %c0_25 = arith.constant 0 : index
    %c0_26 = arith.constant 0 : index
    %33 = vector.load %arg5[%c0_25, %c0_26] : memref<114x25xf32, #tpu.memory_space<vmem>>, vector<114x25xf32>
    tpu.vector_store %arg5[%c0_25, %c0_26], %32 {strides = array<i32>} : memref<114x25xf32, #tpu.memory_space<vmem>>, vector<114x25xf32>,
    return
  }
}

</mosaic_0001>

<bundles_post_ra>
// kernel: gcn_class_forward.1
= control target key start
LH: loop header
LB: loop body
LE: loop exit
PB: predicated region body
PF: predicated region fallthrough
CT: control target
= control target key end

     0   :  { %vm122_vm0 = vcmask 1040384   ;;  %vm97_vm1 = vcmask 932864   ;;  %vm270_vm2 = vcmask 1043456   ;;  %vm271_vm3 = vcmask 1044480   ;;  %s1597_s0 = inlined_call_operand.vmem [shape: f32[114,25], index: 0, kind: input, shape index: {}]   ;;  %s1598_s3 = inlined_call_operand.vmem [shape: bf16[2,114,114], index: 3, kind: input, shape index: {}]   ;;  %s1599_s1 = inlined_call_operand.vmem [shape: bf16[25,32], index: 1, kind: input, shape index: {}]   ;;  %s1600_s2 = inlined_call_operand.vmem [shape: bf16[32,25], index: 2, kind: input, shape index: {}]   ;;  %s1601_s4 = inlined_call_operand.vmem [shape: f32[4,114,32], index: 4, kind: input, shape index: {}]   ;;  %s1602_s5 = inlined_call_operand.vmem [shape: f32[114,25], index: 5, kind: output, shape index: {}]  }
   0x1   :  { %v35_v0 = vld [vmem:[%s1597_s0 + $0x70] sm:$0x3]  ;;  %v33_v1 = vld [vmem:[%s1597_s0 + $0x60] sm:$0xff]  ;;  %v34_v2 = vld [vmem:[%s1597_s0 + $0x68] sm:$0xff]  ;;  %v1184_v33 = vmov 65535   ;;  %vm245_vm4 = vcmask 203776  }
   0x2   :  { %v43_v3 = vpack.c.bf16 %v35_v0, %v35_v0  ;;  %v42_v4 = vpack.c.bf16 %v34_v2, %v33_v1  ;;  %v31_v5 = vld [vmem:[%s1597_s0 + $0x50] sm:$0xff]  ;;  %v32_v6 = vld [vmem:[%s1597_s0 + $0x58] sm:$0xff]  ;;  %v29_v8 = vld [vmem:[%s1597_s0 + $0x40] sm:$0xff]  ;;  %v272_v34 = vsel %vm270_vm2, 4294967295, %v1184_v33  ;;  %vm473_vm5 = vcmask 261120  }
   0x3   :  { %v41_v9 = vpack.c.bf16 %v32_v6, %v31_v5  ;;  %v1164_v10 = vld [vmem:[%s1598_s3] sm:$0xff]   ;;  %v30_v11 = vld [vmem:[%s1597_s0 + $0x48] sm:$0xff]  ;;  %v27_v13 = vld [vmem:[%s1597_s0 + $0x30] sm:$0xff]  ;;  %v273_v35 = vsel %vm271_vm3, %v272_v34, 0  ;;  %vm870_vm6 = vcmask 197632  }
   0x4   :  { %1160 = vmatprep.subr.msk.bf16.mxu0 %vm122_vm0, %v43_v3  ;;  %v124_v7 = vsel %vm122_vm0, %v43_v3, 0  ;;  %1056 = vmatprep.mubr.msk.bf16.mxu0 %vm97_vm1, %v1164_v10  ;;  %v40_v12 = vpack.c.bf16 %v30_v11, %v29_v8  ;;  %v28_v14 = vld [vmem:[%s1597_s0 + $0x38] sm:$0xff]  ;;  %v25_v15 = vld [vmem:[%s1597_s0 + $0x20] sm:$0xff]  ;;  %v26_v16 = vld [vmem:[%s1597_s0 + $0x28] sm:$0xff] }
   0x5   :  { %1041 = vmatpush3.bf16.msra.mxu0 %v124_v7  ;;  %v39_v17 = vpack.c.bf16 %v28_v14, %v27_v13  ;;  %v38_v18 = vpack.c.bf16 %v26_v16, %v25_v15  ;;  %v23_v19 = vld [vmem:[%s1597_s0 + $0x10] sm:$0xff]  ;;  %v24_v20 = vld [vmem:[%s1597_s0 + $0x18] sm:$0xff]  ;;  %v21_v22 = vld [vmem:[%s1597_s0] sm:$0xff] }
   0x6   :  { %1042 = vmatprep.subr.bf16.mxu0 %v42_v4  ;;  %v37_v21 = vpack.c.bf16 %v24_v20, %v23_v19  ;;  %v22_v23 = vld [vmem:[%s1597_s0 + $0x8] sm:$0xff]  ;;  %v1166_v26 = vld [vmem:[%s1598_s3 + $0x10] sm:$0xff]   ;;  %v1167_v27 = vld [vmem:[%s1598_s3 + $0x18] sm:$0xff]  }
   0x7   :  { %v36_v24 = vpack.c.bf16 %v22_v23, %v21_v22  ;;  %v1165_v25 = vld [vmem:[%s1598_s3 + $0x8] sm:$0xff]   ;;  %v1168_v28 = vld [vmem:[%s1598_s3 + $0x20] sm:$0xff]   ;;  %v1170_v30 = vld [vmem:[%s1598_s3 + $0x30] sm:$0xff]  }
   0x8   :  { %v1169_v29 = vld [vmem:[%s1598_s3 + $0x28] sm:$0xff]   ;;  %v1171_v31 = vld [vmem:[%s1598_s3 + $0x38] ss:$0 sps:$4 sm:$0x11]   ;;  %v1173_v37 = vld [vmem:[%s1599_s1] sm:$0xff]  }
   0x9   :  { %1043 = vmatpush3.bf16.msra.mxu0 %v42_v4  ;;  %v1172_v32 = vld [vmem:[%s1599_s1 + $0x8] sm:$0x1f]   ;;  %v1175_v63 = vld [vmem:[%s1600_s2] sm:$0xff]   ;;  %v375_v2 = vld [vmem:[%s1601_s4 + $0x10] sm:$0xff] }
   0xa   :  { %1044 = vmatprep.subr.bf16.mxu0 %v41_v9  ;;  %v275_v36 = vand.u32 %v1172_v32, %v273_v35  ;;  %v1174_v38 = vld [vmem:[%s1600_s2 + $0x8] sm:$0xff]   ;;  %v373_v1 = vld [vmem:[%s1601_s4] sm:$0xff]  ;;  %v376_v4 = vld [vmem:[%s1601_s4 + $0x18] sm:$0xff] }
   0xb   :  { %v902_v7 = vld [vmem:[%s1601_s4 + $0x78] sm:$0xff]  ;;  %v374_v10 = vld [vmem:[%s1601_s4 + $0x8] sm:$0xff]  ;;  %v903_v14 = vld [vmem:[%s1601_s4 + $0x80] sm:$0xff] }
   0xc   :  { %1072 = vmatprep.subr.bf16.mxu1 %v275_v36  ;;  %v904_v11 = vld [vmem:[%s1601_s4 + $0x88] sm:$0xff]  ;;  %v377_v20 = vld [vmem:[%s1601_s4 + $0x20] sm:$0xff]  ;;  %v379_v22 = vld [vmem:[%s1601_s4 + $0x30] sm:$0xff] }
   0xd   :  { %1045 = vmatpush3.bf16.msra.mxu0 %v41_v9  ;;  %1073 = vmatpush3.bf16.msra.mxu1 %v275_v36  ;;  %v905_v9 = vld [vmem:[%s1601_s4 + $0x90] sm:$0xff]  ;;  %v378_v34 = vld [vmem:[%s1601_s4 + $0x28] sm:$0xff] }
   0xe   :  { %1046 = vmatprep.subr.bf16.mxu0 %v40_v12  ;;  %1074 = vmatprep.subr.bf16.mxu1 %v1173_v37  ;;  %v909_v33 = vld [vmem:[%s1601_s4 + $0xb0] sm:$0xff]  ;;  %v908_v36 = vld [vmem:[%s1601_s4 + $0xa8] sm:$0xff] }
  0x11   :  { %1047 = vmatpush3.bf16.msra.mxu0 %v40_v12  ;;  %1075 = vmatpush3.bf16.msra.mxu1 %v1173_v37 }
  0x12   :  { %1048 = vmatprep.subr.bf16.mxu0 %v39_v17  ;;  %1092 = vmatprep.subr.bf16.mxu1 %v1174_v38 }
  0x15   :  { %1049 = vmatpush3.bf16.msra.mxu0 %v39_v17 }
  0x16   :  { %1050 = vmatprep.subr.bf16.mxu0 %v38_v18 }
  0x19   :  { %1051 = vmatpush3.bf16.msra.mxu0 %v38_v18 }
  0x1a   :  { %1052 = vmatprep.subr.bf16.mxu0 %v37_v21 }
  0x1d   :  { %1053 = vmatpush3.bf16.msra.mxu0 %v37_v21 }
  0x1e   :  { %1054 = vmatprep.subr.bf16.mxu0 %v36_v24 }
  0x21   :  { %1055 = vmatpush3.bf16.msra.mxu0 %v36_v24 }
  0x24   :  { %1057 = vmatmul.mubr.msk.bf16.vlgmr.msra.gmra.mxu0 %vm97_vm1, %v1165_v25  ;;  %v380_v25 = vld [vmem:[%s1601_s4 + $0x38] sm:$0xff] }
  0x25   :  { %1060 = vmatprep.mubr.msk.bf16.mxu0 %vm97_vm1, %v1166_v26 }
  0x2c   :  { %1061 = vmatmul.mubr.msk.bf16.gmra.mxu0 %vm97_vm1, %v1167_v27 }
  0x2d   :  { %1064 = vmatprep.mubr.msk.bf16.mxu0 %vm97_vm1, %v1168_v28 }
  0x34   :  { %1065 = vmatmul.mubr.msk.bf16.gmra.mxu0 %vm97_vm1, %v1169_v29 }
  0x35   :  { %1068 = vmatprep.mubr.msk.bf16.mxu0 %vm97_vm1, %v1170_v30 }
  0x3c   :  { %1069 = vmatmul.mubr.msk.bf16.gmra.mxu0 %vm97_vm1, %v1171_v31  ;;  %v906_v31 = vld [vmem:[%s1601_s4 + $0x98] sm:$0xff] }
  0xe4   :  { %v1058_v39 = vpop.f32.mrf.mxu0 }
  0xe6   :  { %v160_v40 = vpop.f32.mrf.mxu0 }
  0xe8   :  { %v1059_v41 = vpop.f32.mrf.mxu0 }
  0xe9   :  { %v223_v44 = vpack.c.bf16 %v1059_v41, %v1058_v39 }
  0xea   :  { %v163_v42 = vpop.f32.mrf.mxu0 }
  0xeb   :  { %v222_v43 = vpack.c.bf16 %v163_v42, %v160_v40  ;;  %v907_v40 = vld [vmem:[%s1601_s4 + $0xa0] sm:$0xff] }
  0xec   :  { %v1062_v45 = vpop.f32.mrf.mxu0 }
  0xed   :  { %1076 = vmatprep.mubr.msk.bf16.mxu1 %vm245_vm4, %v222_v43 }
  0xee   :  { %v176_v46 = vpop.f32.mrf.mxu0  ;;  %1077 = vmatmul.mubr.msk.bf16.vlgmr.msra.gmra.mxu1 %vm245_vm4, %v223_v44 }
  0xef   :  { %1093 = vmatpush3.bf16.msra.mxu1 %v1174_v38 }
  0xf0   :  { %v1063_v47 = vpop.f32.mrf.mxu0  ;;  %1094 = vmatprep.subr.bf16.mxu1 %v1175_v63 }
  0xf1   :  { %v225_v50 = vpack.c.bf16 %v1063_v47, %v1062_v45 }
  0xf2   :  { %v179_v48 = vpop.f32.mrf.mxu0 }
  0xf3   :  { %v224_v49 = vpack.c.bf16 %v179_v48, %v176_v46  ;;  %1095 = vmatpush3.bf16.msra.mxu1 %v1175_v63  ;;  %v381_v46 = vld [vmem:[%s1601_s4 + $0x40] sm:$0xff]  ;;  %v383_v48 = vld [vmem:[%s1601_s4 + $0x50] sm:$0xff] }
  0xf4   :  { %v1066_v51 = vpop.f32.mrf.mxu0 }
  0xf5   :  { %1080 = vmatprep.mubr.msk.bf16.mxu1 %vm245_vm4, %v224_v49 }
  0xf6   :  { %v192_v52 = vpop.f32.mrf.mxu0  ;;  %1081 = vmatmul.mubr.msk.bf16.gmra.mxu1 %vm245_vm4, %v225_v50 }
  0xf8   :  { %v1067_v53 = vpop.f32.mrf.mxu0 }
  0xf9   :  { %v227_v56 = vpack.c.bf16 %v1067_v53, %v1066_v51  ;;  %v384_v51 = vld [vmem:[%s1601_s4 + $0x58] sm:$0xff] }
  0xfa   :  { %v195_v54 = vpop.f32.mrf.mxu0 }
  0xfb   :  { %v226_v55 = vpack.c.bf16 %v195_v54, %v192_v52 }
  0xfc   :  { %v1070_v57 = vpop.f32.mrf.mxu0 }
  0xfd   :  { %1084 = vmatprep.mubr.msk.bf16.mxu1 %vm245_vm4, %v226_v55  ;;  %v229_v62 = vpack.c.bf16 %v1070_v57, %v1070_v57  ;;  %v910_v57 = vld [vmem:[%s1601_s4 + $0xb8] sm:$0xff] }
  0xfe   :  { %v208_v58 = vpop.f32.mrf.mxu0  ;;  %1085 = vmatmul.mubr.msk.bf16.gmra.mxu1 %vm245_vm4, %v227_v56 }
 0x100   :  { %v1071_v59 = vpop.f32.mrf.mxu0 }
 0x101   :  { %v913_v59 = vld [vmem:[%s1601_s4 + $0xd0] sm:$0xff] }
 0x102   :  { %v211_v60 = vpop.f32.mrf.mxu0 }
 0x103   :  { %v228_v61 = vpack.c.bf16 %v211_v60, %v208_v58  ;;  %v382_v60 = vld [vmem:[%s1601_s4 + $0x48] sm:$0xff] }
 0x105   :  { %1088 = vmatprep.mubr.msk.bf16.mxu1 %vm245_vm4, %v228_v61 }
 0x106   :  { %1089 = vmatmul.mubr.msk.bf16.gmra.mxu1 %vm245_vm4, %v229_v62  ;;  %v912_v62 = vld [vmem:[%s1601_s4 + $0xc8] sm:$0xff] }
 0x1ae   :  { %v1078_v0 = vpop.f32.mrf.mxu1 }
 0x1af   :  { %v390_v6 = vmul.f32 %v1078_v0, %v375_v2  ;;  %v911_v2 = vld [vmem:[%s1601_s4 + $0xc0] sm:$0xff] }
 0x1b0   :  { %v311_v3 = vpop.f32.mrf.mxu1 }
 0x1b1   :  { %v388_v5 = vmul.f32 %v373_v1, %v311_v3  ;;  %v421_v18 = vadd.f32 %v904_v11, %v390_v6  ;;  %v387_v6 = vld [vmem:[%s1601_s4 + $0x70] sm:$0x3] }
 0x1b2   :  { %v1079_v8 = vpop.f32.mrf.mxu1 }
 0x1b3   :  { %v391_v12 = vmul.f32 %v1079_v8, %v376_v4  ;;  %v419_v15 = vadd.f32 %v902_v7, %v388_v5  ;;  %v436_v29 = vmax.f32 %v421_v18, 0.0 }
 0x1b4   :  { %v314_v13 = vpop.f32.mrf.mxu1 }
 0x1b5   :  { %v422_v16 = vadd.f32 %v905_v9, %v391_v12  ;;  %v389_v17 = vmul.f32 %v374_v10, %v314_v13  ;;  %v434_v26 = vmax.f32 %v419_v15, 0.0  ;;  %v385_v9 = vld [vmem:[%s1601_s4 + $0x60] sm:$0xff] }
 0x1b6   :  { %v1082_v19 = vpop.f32.mrf.mxu1 }
 0x1b7   :  { %v420_v21 = vadd.f32 %v903_v14, %v389_v17  ;;  %v437_v23 = vmax.f32 %v422_v16, 0.0  ;;  %v394_v30 = vmul.f32 %v1082_v19, %v379_v22  ;;  %v916_v16 = vld [vmem:[%s1601_s4 + $0xe8] sm:$0x3]  ;;  %v914_v19 = vld [vmem:[%s1601_s4 + $0xd8] sm:$0xff] }
 0x1b8   :  { %v327_v24 = vpop.f32.mrf.mxu1 }
 0x1b9   :  { %v435_v27 = vmax.f32 %v420_v21, 0.0  ;;  %v392_v28 = vmul.f32 %v377_v20, %v327_v24  ;;  %v450_v38 = vpack.c.bf16 %v437_v23, %v436_v29  ;;  %v425_v44 = vadd.f32 %v908_v36, %v394_v30  ;;  %v386_v21 = vld [vmem:[%s1601_s4 + $0x68] sm:$0xff] }
 0x1ba   :  { %v1083_v32 = vpop.f32.mrf.mxu1  ;;  %v1180_v36 = vld [vmem:[%s1598_s3 + $0x6c] sm:$0xff]  }
 0x1bb   :  { %v449_v35 = vpack.c.bf16 %v435_v27, %v434_v26  ;;  %v395_v37 = vmul.f32 %v1083_v32, %v380_v25  ;;  %v423_v41 = vadd.f32 %v906_v31, %v392_v28  ;;  %v440_v55 = vmax.f32 %v425_v44, 0.0  ;;  %v915_v26 = vld [vmem:[%s1601_s4 + $0xe0] sm:$0xff] }
 0x1bc   :  { %v330_v39 = vpop.f32.mrf.mxu1 }
 0x1bd   :  { %v426_v42 = vadd.f32 %v909_v33, %v395_v37  ;;  %v393_v43 = vmul.f32 %v378_v34, %v330_v39  ;;  %1096 = vmatprep.mubr.msk.bf16.mxu1 %vm473_vm5, %v449_v35  ;;  %v438_v52 = vmax.f32 %v423_v41, 0.0  ;;  %v1176_v35 = vld [vmem:[%s1598_s3 + $0x3c] sm:$0xff]  }
 0x1be   :  { %v1086_v45 = vpop.f32.mrf.mxu1  ;;  %1097 = vmatmul.mubr.msk.bf16.vlgmr.msra.gmra.mxu1 %vm473_vm5, %v450_v38  ;;  %1128 = vmatprep.mubr.msk.bf16.mxu0 %vm97_vm1, %v1176_v35 }
 0x1bf   :  { %v424_v47 = vadd.f32 %v907_v40, %v393_v43  ;;  %v441_v49 = vmax.f32 %v426_v42, 0.0  ;;  %v398_v56 = vmul.f32 %v1086_v45, %v383_v48 }
 0x1c0   :  { %v343_v50 = vpop.f32.mrf.mxu1 }
 0x1c1   :  { %v439_v53 = vmax.f32 %v424_v47, 0.0  ;;  %v396_v54 = vmul.f32 %v381_v46, %v343_v50  ;;  %v452_v0 = vpack.c.bf16 %v441_v49, %v440_v55  ;;  %v429_v7 = vadd.f32 %v912_v62, %v398_v56  ;;  %v1177_v62 = vld [vmem:[%s1598_s3 + $0x44] sm:$0xff]  }
 0x1c2   :  { %v1087_v58 = vpop.f32.mrf.mxu1 }
 0x1c3   :  { %v451_v61 = vpack.c.bf16 %v439_v53, %v438_v52  ;;  %v399_v63 = vmul.f32 %v1087_v58, %v384_v51  ;;  %v427_v3 = vadd.f32 %v910_v57, %v396_v54  ;;  %v444_v18 = vmax.f32 %v429_v7, 0.0 }
 0x1c4   :  { %v346_v1 = vpop.f32.mrf.mxu1 }
 0x1c5   :  { %v430_v4 = vadd.f32 %v913_v59, %v399_v63  ;;  %v397_v5 = vmul.f32 %v382_v60, %v346_v1  ;;  %1100 = vmatprep.mubr.msk.bf16.mxu1 %vm473_vm5, %v451_v61  ;;  %v442_v14 = vmax.f32 %v427_v3, 0.0  ;;  %v1181_v63 = vld [vmem:[%s1598_s3 + $0x74] ss:$0 sps:$4 sm:$0x11]   ;;  %v1183_v3 = vld [vmem:[%s1598_s3 + $0x64] sm:$0xff]  }
 0x1c6   :  { %v1090_v8 = vpop.f32.mrf.mxu1  ;;  %1101 = vmatmul.mubr.msk.bf16.gmra.mxu1 %vm473_vm5, %v452_v0  ;;  %v1178_v0 = vld [vmem:[%s1598_s3 + $0x4c] sm:$0xff]   ;;  %v1179_v1 = vld [vmem:[%s1598_s3 + $0x54] sm:$0xff]  }
 0x1c7   :  { %v428_v10 = vadd.f32 %v911_v2, %v397_v5  ;;  %v445_v11 = vmax.f32 %v430_v4, 0.0  ;;  %v402_v12 = vmul.f32 %v1090_v8, %v387_v6  ;;  %v1182_v2 = vld [vmem:[%s1598_s3 + $0x5c] sm:$0xff]   ;;  %v958_v8 = vld [vmem:[%s1601_s4 + $0xf0] sm:$0xff] }
 0x1c8   :  { %v359_v13 = vpop.f32.mrf.mxu1  ;;  %v960_v4 = vld [vmem:[%s1601_s4 + $0x100] sm:$0xff]  ;;  %v975_v6 = vld [vmem:[%s1601_s4 + $0x178] sm:$0xff] }
 0x1c9   :  { %v443_v15 = vmax.f32 %v428_v10, 0.0  ;;  %v400_v17 = vmul.f32 %v385_v9, %v359_v13  ;;  %v454_v23 = vpack.c.bf16 %v445_v11, %v444_v18  ;;  %v433_v24 = vadd.f32 %v916_v16, %v402_v12  ;;  %v972_v5 = vld [vmem:[%s1601_s4 + $0x160] sm:$0x3]  ;;  %v987_v10 = vld [vmem:[%s1601_s4 + $0x1d8] sm:$0x3]  ;;  %v970_v11 = vld [vmem:[%s1601_s4 + $0x150] sm:$0xff] }
 0x1ca   :  { %v1091_v20 = vpop.f32.mrf.mxu1  ;;  %v961_v16 = vld [vmem:[%s1601_s4 + $0x108] sm:$0xff] }
 0x1cb   :  { %v453_v22 = vpack.c.bf16 %v443_v15, %v442_v14  ;;  %v431_v27 = vadd.f32 %v914_v19, %v400_v17  ;;  %v448_v30 = vmax.f32 %v433_v24, 0.0  ;;  %v973_v15 = vld [vmem:[%s1601_s4 + $0x168] sm:$0xff]  ;;  %v976_v24 = vld [vmem:[%s1601_s4 + $0x180] sm:$0xff] }
 0x1cc   :  { %v362_v25 = vpop.f32.mrf.mxu1 }
 0x1cd   :  { %v401_v28 = vmul.f32 %v386_v21, %v362_v25  ;;  %1104 = vmatprep.mubr.msk.bf16.mxu1 %vm473_vm5, %v453_v22  ;;  %v446_v31 = vmax.f32 %v431_v27, 0.0  ;;  %v456_v34 = vpack.c.bf16 %v448_v30, %v448_v30  ;;  %v985_v22 = vld [vmem:[%s1601_s4 + $0x1c8] sm:$0xff]  ;;  %v959_v25 = vld [vmem:[%s1601_s4 + $0xf8] sm:$0xff] }
 0x1ce   :  { %1105 = vmatmul.mubr.msk.bf16.gmra.mxu1 %vm473_vm5, %v454_v23  ;;  %v971_v27 = vld [vmem:[%s1601_s4 + $0x158] sm:$0xff] }
 0x1cf   :  { %v432_v29 = vadd.f32 %v915_v26, %v401_v28 }
 0x1d1   :  { %v447_v32 = vmax.f32 %v432_v29, 0.0 }
 0x1d3   :  { %v455_v33 = vpack.c.bf16 %v447_v32, %v446_v31 }
 0x1d5   :  { %1108 = vmatprep.mubr.msk.bf16.mxu1 %vm473_vm5, %v455_v33  ;;  %v974_v33 = vld [vmem:[%s1601_s4 + $0x170] sm:$0xff] }
 0x1d6   :  { %1109 = vmatmul.mubr.msk.bf16.gmra.mxu1 %vm473_vm5, %v456_v34  ;;  %v964_v34 = vld [vmem:[%s1601_s4 + $0x120] sm:$0xff] }
 0x1d7   :  { %1140 = vmatprep.mubr.msk.bf16.mxu1 %vm97_vm1, %v1180_v36 }
 0x27e   :  { %v1098_v37 = vpop.f32.mrf.mxu1 }
 0x280   :  { %v532_v38 = vpop.f32.mrf.mxu1 }
 0x282   :  { %v1099_v39 = vpop.f32.mrf.mxu1 }
 0x283   :  { %v611_v60 = vpack.c.bf16 %v1099_v39, %v1098_v37  ;;  %v986_v37 = vld [vmem:[%s1601_s4 + $0x1d0] sm:$0xff] }
 0x284   :  { %v535_v40 = vpop.f32.mrf.mxu1 }
 0x285   :  { %v610_v61 = vpack.c.bf16 %v535_v40, %v532_v38 }
 0x286   :  { %v1102_v41 = vpop.f32.mrf.mxu1 }
 0x288   :  { %v548_v42 = vpop.f32.mrf.mxu1 }
 0x28a   :  { %v1103_v43 = vpop.f32.mrf.mxu1 }
 0x28b   :  { %v613_v58 = vpack.c.bf16 %v1103_v43, %v1102_v41  ;;  %v979_v43 = vld [vmem:[%s1601_s4 + $0x198] sm:$0xff] }
 0x28c   :  { %v551_v44 = vpop.f32.mrf.mxu1 }
 0x28d   :  { %v612_v59 = vpack.c.bf16 %v551_v44, %v548_v42  ;;  %v962_v44 = vld [vmem:[%s1601_s4 + $0x110] sm:$0xff] }
 0x28e   :  { %v1106_v45 = vpop.f32.mrf.mxu1 }
 0x290   :  { %v564_v46 = vpop.f32.mrf.mxu1 }
 0x292   :  { %v1107_v47 = vpop.f32.mrf.mxu1 }
 0x293   :  { %v615_v56 = vpack.c.bf16 %v1107_v47, %v1106_v45 }
 0x294   :  { %v567_v48 = vpop.f32.mrf.mxu1 }
 0x295   :  { %v614_v57 = vpack.c.bf16 %v567_v48, %v564_v46 }
 0x296   :  { %v1110_v49 = vpop.f32.mrf.mxu1 }
 0x297   :  { %v617_v50 = vpack.c.bf16 %v1110_v49, %v1110_v49 }
 0x298   :  { %v580_v51 = vpop.f32.mrf.mxu1 }
 0x299   :  { %1161 = vmatprep.subr.msk.bf16.mxu0 %vm122_vm0, %v617_v50  ;;  %1162 = vmatprep.subr.msk.bf16.mxu1 %vm122_vm0, %v617_v50  ;;  %v681_v52 = vsel %vm122_vm0, %v617_v50, 0 }
 0x29a   :  { %v1111_v53 = vpop.f32.mrf.mxu1  ;;  %1113 = vmatpush3.bf16.msra.mxu0 %v681_v52  ;;  %1152 = vmatpush3.bf16.msra.mxu1 %v681_v52  ;;  %v965_v52 = vld [vmem:[%s1601_s4 + $0x128] sm:$0xff] }
 0x29c   :  { %v583_v54 = vpop.f32.mrf.mxu1 }
 0x29d   :  { %v616_v55 = vpack.c.bf16 %v583_v54, %v580_v51  ;;  %v977_v51 = vld [vmem:[%s1601_s4 + $0x188] sm:$0xff] }
 0x29f   :  { %1114 = vmatprep.subr.bf16.mxu0 %v616_v55  ;;  %1145 = vmatprep.subr.bf16.mxu1 %v616_v55 }
 0x2a0   :  { %1115 = vmatpush3.bf16.msra.mxu0 %v616_v55  ;;  %1153 = vmatpush3.bf16.msra.mxu1 %v616_v55 }
 0x2a1   :  { %1116 = vmatprep.subr.bf16.mxu0 %v615_v56  ;;  %1146 = vmatprep.subr.bf16.mxu1 %v615_v56 }
 0x2a4   :  { %1117 = vmatpush3.bf16.msra.mxu0 %v615_v56  ;;  %1154 = vmatpush3.bf16.msra.mxu1 %v615_v56 }
 0x2a5   :  { %1118 = vmatprep.subr.bf16.mxu0 %v614_v57  ;;  %1147 = vmatprep.subr.bf16.mxu1 %v614_v57 }
 0x2a8   :  { %1119 = vmatpush3.bf16.msra.mxu0 %v614_v57  ;;  %1155 = vmatpush3.bf16.msra.mxu1 %v614_v57 }
 0x2a9   :  { %1120 = vmatprep.subr.bf16.mxu0 %v613_v58  ;;  %1148 = vmatprep.subr.bf16.mxu1 %v613_v58 }
 0x2ac   :  { %1121 = vmatpush3.bf16.msra.mxu0 %v613_v58  ;;  %1156 = vmatpush3.bf16.msra.mxu1 %v613_v58  ;;  %v980_v58 = vld [vmem:[%s1601_s4 + $0x1a0] sm:$0xff] }
 0x2ad   :  { %1122 = vmatprep.subr.bf16.mxu0 %v612_v59  ;;  %1149 = vmatprep.subr.bf16.mxu1 %v612_v59 }
 0x2b0   :  { %1123 = vmatpush3.bf16.msra.mxu0 %v612_v59  ;;  %1157 = vmatpush3.bf16.msra.mxu1 %v612_v59  ;;  %v963_v59 = vld [vmem:[%s1601_s4 + $0x118] sm:$0xff] }
 0x2b1   :  { %1124 = vmatprep.subr.bf16.mxu0 %v611_v60  ;;  %1150 = vmatprep.subr.bf16.mxu1 %v611_v60 }
 0x2b4   :  { %1125 = vmatpush3.bf16.msra.mxu0 %v611_v60  ;;  %1158 = vmatpush3.bf16.msra.mxu1 %v611_v60 }
 0x2b5   :  { %1126 = vmatprep.subr.bf16.mxu0 %v610_v61  ;;  %1151 = vmatprep.subr.bf16.mxu1 %v610_v61 }
 0x2b8   :  { %1127 = vmatpush3.bf16.msra.mxu0 %v610_v61  ;;  %1159 = vmatpush3.bf16.msra.mxu1 %v610_v61 }
 0x2bb   :  { %1129 = vmatmul.mubr.msk.bf16.vlgmr.msra.gmra.mxu0 %vm97_vm1, %v1177_v62  ;;  %1141 = vmatmul.mubr.msk.bf16.vlgmr.msra.gmra.mxu1 %vm97_vm1, %v1181_v63 }
 0x2bc   :  { %1132 = vmatprep.mubr.msk.bf16.mxu0 %vm97_vm1, %v1178_v0  ;;  %v978_v0 = vld [vmem:[%s1601_s4 + $0x190] sm:$0xff] }
 0x2c3   :  { %1133 = vmatmul.mubr.msk.bf16.gmra.mxu0 %vm97_vm1, %v1179_v1  ;;  %v968_v1 = vld [vmem:[%s1601_s4 + $0x140] sm:$0xff] }
 0x2c4   :  { %1136 = vmatprep.mubr.msk.bf16.mxu0 %vm97_vm1, %v1182_v2 }
 0x2cb   :  { %1137 = vmatmul.mubr.msk.bf16.gmra.mxu0 %vm97_vm1, %v1183_v3 }
 0x37b   :  { %v1130_v7 = vpop.f32.mrf.mxu0  ;;  %v1142_v9 = vpop.f32.mrf.mxu1 }
 0x37c   :  { %v797_v12 = vmul.f32 %v1130_v7, %v960_v4  ;;  %v809_v13 = vmul.f32 %v1142_v9, %v972_v5  ;;  %v966_v7 = vld [vmem:[%s1601_s4 + $0x130] sm:$0xff] }
 0x37d   :  { %v717_v14 = vpop.f32.mrf.mxu0  ;;  %v765_v17 = vpop.f32.mrf.mxu1 }
 0x37e   :  { %v828_v18 = vadd.f32 %v975_v6, %v797_v12  ;;  %v795_v19 = vmul.f32 %v958_v8, %v717_v14  ;;  %v840_v20 = vadd.f32 %v987_v10, %v809_v13  ;;  %v807_v21 = vmul.f32 %v970_v11, %v765_v17  ;;  %v983_v6 = vld [vmem:[%s1601_s4 + $0x1b8] sm:$0xff]  ;;  %v981_v12 = vld [vmem:[%s1601_s4 + $0x1a8] sm:$0xff] }
 0x37f   :  { %v1131_v23 = vpop.f32.mrf.mxu0  ;;  %v1143_v26 = vpop.f32.mrf.mxu1  ;;  %v969_v13 = vld [vmem:[%s1601_s4 + $0x148] sm:$0xff] }
 0x380   :  { %v843_v28 = vmax.f32 %v828_v18, 0.0  ;;  %v826_v29 = vadd.f32 %v973_v15, %v795_v19  ;;  %v798_v30 = vmul.f32 %v1131_v23, %v961_v16  ;;  %v855_v31 = vmax.f32 %v840_v20, 0.0  ;;  %v984_v18 = vld [vmem:[%s1601_s4 + $0x1c0] sm:$0xff]  ;;  %v967_v19 = vld [vmem:[%s1601_s4 + $0x138] sm:$0xff] }
 0x381   :  { %v720_v32 = vpop.f32.mrf.mxu0  ;;  %v838_v35 = vadd.f32 %v985_v22, %v807_v21  ;;  %v768_v36 = vpop.f32.mrf.mxu1 }
 0x382   :  { %858 = vst.msk [vmem:[%s1602_s5 + $0x10] sm:$0xff] %vm245_vm4, %v843_v28  ;;  %v841_v38 = vmax.f32 %v826_v29, 0.0  ;;  %v829_v39 = vadd.f32 %v976_v24, %v798_v30  ;;  %v796_v40 = vmul.f32 %v959_v25, %v720_v32  ;;  %v808_v41 = vmul.f32 %v971_v27, %v768_v36  ;;  %v982_v24 = vld [vmem:[%s1601_s4 + $0x1b0] sm:$0xff] }
 0x383   :  { %871 = vst.msk [vmem:[%s1602_s5 + $0x70] sm:$0x3] %vm870_vm6, %v855_v31  ;;  %v1134_v42 = vpop.f32.mrf.mxu0  ;;  %v853_v45 = vmax.f32 %v838_v35, 0.0 }
 0x384   :  { %856 = vst.msk [vmem:[%s1602_s5] sm:$0xff] %vm245_vm4, %v841_v38  ;;  %v844_v46 = vmax.f32 %v829_v39, 0.0  ;;  %v827_v47 = vadd.f32 %v974_v33, %v796_v40  ;;  %v801_v48 = vmul.f32 %v1134_v42, %v964_v34  ;;  %v839_v49 = vadd.f32 %v986_v37, %v808_v41 }
 0x385   :  { %v733_v50 = vpop.f32.mrf.mxu0  ;;  %868 = vst.msk [vmem:[%s1602_s5 + $0x60] sm:$0xff] %vm245_vm4, %v853_v45 }
 0x386   :  { %859 = vst.msk [vmem:[%s1602_s5 + $0x18] sm:$0xff] %vm245_vm4, %v844_v46  ;;  %v842_v53 = vmax.f32 %v827_v47, 0.0  ;;  %v832_v54 = vadd.f32 %v979_v43, %v801_v48  ;;  %v799_v55 = vmul.f32 %v962_v44, %v733_v50  ;;  %v854_v56 = vmax.f32 %v839_v49, 0.0 }
 0x387   :  { %v1135_v57 = vpop.f32.mrf.mxu0 }
 0x388   :  { %857 = vst.msk [vmem:[%s1602_s5 + $0x8] sm:$0xff] %vm245_vm4, %v842_v53  ;;  %v847_v60 = vmax.f32 %v832_v54, 0.0  ;;  %v830_v61 = vadd.f32 %v977_v51, %v799_v55  ;;  %v802_v62 = vmul.f32 %v1135_v57, %v965_v52  ;;  %869 = vst.msk [vmem:[%s1602_s5 + $0x68] sm:$0xff] %vm245_vm4, %v854_v56 }
 0x389   :  { %v736_v63 = vpop.f32.mrf.mxu0 }
 0x38a   :  { %862 = vst.msk [vmem:[%s1602_s5 + $0x30] sm:$0xff] %vm245_vm4, %v847_v60  ;;  %v845_v2 = vmax.f32 %v830_v61, 0.0  ;;  %v833_v3 = vadd.f32 %v980_v58, %v802_v62  ;;  %v800_v4 = vmul.f32 %v963_v59, %v736_v63 }
 0x38b   :  { %v1138_v5 = vpop.f32.mrf.mxu0 }
 0x38c   :  { %860 = vst.msk [vmem:[%s1602_s5 + $0x20] sm:$0xff] %vm245_vm4, %v845_v2  ;;  %v848_v8 = vmax.f32 %v833_v3, 0.0  ;;  %v831_v9 = vadd.f32 %v978_v0, %v800_v4  ;;  %v805_v10 = vmul.f32 %v1138_v5, %v968_v1 }
 0x38d   :  { %v749_v11 = vpop.f32.mrf.mxu0 }
 0x38e   :  { %863 = vst.msk [vmem:[%s1602_s5 + $0x38] sm:$0xff] %vm245_vm4, %v848_v8  ;;  %v846_v14 = vmax.f32 %v831_v9, 0.0  ;;  %v836_v15 = vadd.f32 %v983_v6, %v805_v10  ;;  %v803_v16 = vmul.f32 %v966_v7, %v749_v11 }
 0x38f   :  { %v1139_v17 = vpop.f32.mrf.mxu0 }
 0x390   :  { %861 = vst.msk [vmem:[%s1602_s5 + $0x28] sm:$0xff] %vm245_vm4, %v846_v14  ;;  %v851_v20 = vmax.f32 %v836_v15, 0.0  ;;  %v834_v21 = vadd.f32 %v981_v12, %v803_v16  ;;  %v806_v22 = vmul.f32 %v1139_v17, %v969_v13 }
 0x391   :  { %v752_v23 = vpop.f32.mrf.mxu0 }
 0x392   :  { %866 = vst.msk [vmem:[%s1602_s5 + $0x50] sm:$0xff] %vm245_vm4, %v851_v20  ;;  %v849_v25 = vmax.f32 %v834_v21, 0.0  ;;  %v837_v26 = vadd.f32 %v984_v18, %v806_v22  ;;  %v804_v27 = vmul.f32 %v967_v19, %v752_v23 }
 0x394   :  { %864 = vst.msk [vmem:[%s1602_s5 + $0x40] sm:$0xff] %vm245_vm4, %v849_v25  ;;  %v852_v28 = vmax.f32 %v837_v26, 0.0  ;;  %v835_v29 = vadd.f32 %v982_v24, %v804_v27 }
 0x396   :  { %867 = vst.msk [vmem:[%s1602_s5 + $0x58] sm:$0xff] %vm245_vm4, %v852_v28  ;;  %v850_v30 = vmax.f32 %v835_v29, 0.0 }
 0x398   :  { %865 = vst.msk [vmem:[%s1602_s5 + $0x48] sm:$0xff] %vm245_vm4, %v850_v30 }

</bundles_post_ra>
